<compile_context>
chip_gen: v5e
topology: v5e:2x2
jax: 0.10.0
libtpu: 0.0.40
codegen_flags: <defaults>
</compile_context>

<pallas_src>
import functools

import jax
import jax.numpy as jnp
from jax import lax
from jax.experimental import pallas as pl
from jax.experimental.pallas import tpu as pltpu


def mlp_kernel(x_ref, w1_ref, b1_ref, w2_ref, b2_ref, w3_ref, b3_ref, o_ref):
    """One batch tile. x in natural layout, intermediates batch-on-lanes.

    x_ref : [TB, 10] f32 (natural nn.Linear input layout)
    w1_ref: [32, 10] f32   b1_ref: [32, 1] f32
    w2_ref: [16, 32] f32   b2_ref: [16, 1] f32
    w3_ref: [1, 16]  f32   b3_ref: [1, 1]  f32
    o_ref : [1, TB]  f32 (lane-dense output row)
    """
    # Layer 1: contract over x's last axis -> [32, TB] (batch lands on lanes).
    # Same dimension numbers as a q @ k.T attention-score matmul.
    h1 = lax.dot_general(
        w1_ref[...], x_ref[...],
        dimension_numbers=(((1,), (1,)), ((), ())),
        preferred_element_type=jnp.float32)                        # [32, TB]
    h1 = jnp.maximum(h1 + b1_ref[...], 0.0)
    # Layer 2: [16,32] @ [32,TB] -> [16,TB] on the MXU (f32 throughout, no cast).
    h2 = jnp.dot(w2_ref[...], h1, preferred_element_type=jnp.float32)
    h2 = jnp.maximum(h2 + b2_ref[...], 0.0)
    # Layer 3 on the MXU (its slot is <1% utilized): [1,16] @ [16,TB] -> [1,TB].
    logits = jnp.dot(w3_ref[...], h2, preferred_element_type=jnp.float32)
    logits = logits + b3_ref[...]
    # Sigmoid via a single EUP tanh: sigmoid(z) = 0.5 * tanh(z/2) + 0.5.
    o_ref[...] = (0.5 * jnp.tanh(0.5 * logits) + 0.5).astype(o_ref.dtype)


def _pick_batch_tile(B, block_b):
    """Lane-aligned batch tile: multiple of 128, capped, >=2 tiles when possible."""
    if B <= 128:
        return B          # single full-extent block (always a legal block shape)
    # At least two tiles so the "parallel" grid axis can shard the batch across
    # both v7x TensorCores; cap at block_b to respect the VMEM budget.
    return min(block_b, max(128, pl.cdiv(B, 2 * 128) * 128))


@functools.partial(jax.jit, static_argnames=("block_b",))
def binary_classifier_forward(x, params, *, block_b=16384):
    """x: [B, 10] f32 -> [B, 1] f32 sigmoid probabilities.

    params use PyTorch nn.Linear layout: w* are [out_features, in_features],
    b* are [out_features].

    block_b: max batch tile (lanes).  The default 16K tile keeps the in-flight
    VMEM (~25 MiB: double-buffered 128-lane-padded x block + f32 h1/h2 + out)
    under the 48 MiB limit below, which is safe on v7x's 64 MiB physical VMEM;
    v5e/v6e (128 MiB) can sweep block_b higher.
    """
    B, F = x.shape
    tb = _pick_batch_tile(B, block_b)
    grid = (pl.cdiv(B, tb),)      # last block may be ragged; tail lanes discarded

    w1 = params["w1"]                           # [32, 10]
    w2 = params["w2"]                           # [16, 32]
    w3 = params["w3"].reshape(1, -1)            # [1, 16]
    b1 = params["b1"].reshape(-1, 1)            # [32, 1]
    b2 = params["b2"].reshape(-1, 1)            # [16, 1]
    b3 = params["b3"].reshape(1, 1)             # [1, 1]

    const = lambda a: pl.BlockSpec(a.shape, lambda i: (0, 0))   # VMEM-resident

    out = pl.pallas_call(
        mlp_kernel,
        out_shape=jax.ShapeDtypeStruct((1, B), jnp.float32),
        grid=grid,
        in_specs=[
            pl.BlockSpec((tb, F), lambda i: (i, 0)),   # x: streamed, natural layout
            const(w1), const(b1),
            const(w2), const(b2),
            const(w3), const(b3),
        ],
        out_specs=pl.BlockSpec((1, tb), lambda i: (0, i)),  # lane-dense output row
        compiler_params=pltpu.CompilerParams(
            dimension_semantics=("parallel",),   # shard batch tiles across TCs (v7x)
            vmem_limit_bytes=48 * 1024 * 1024,   # v7x-safe cap (64 MiB physical)
        ),
    )(x, w1, b1, w2, b2, w3, b3)

    # (1, B) -> (B, 1) is a free bitcast; no slice copy since we never padded B.
    return out.reshape(B, 1)


def init_params(key):
    """Deterministic init mimicking nn.Linear default (uniform +/- 1/sqrt(fan_in)).

    Weights stored in PyTorch layout: [out_features, in_features]."""
    def linear(key, fan_in, fan_out):
        kw, kb = jax.random.split(key)
        bound = 1.0 / jnp.sqrt(fan_in)
        w = jax.random.uniform(kw, (fan_out, fan_in), jnp.float32, -bound, bound)
        b = jax.random.uniform(kb, (fan_out,), jnp.float32, -bound, bound)
        return w, b

    k1, k2, k3 = jax.random.split(key, 3)
    w1, b1 = linear(k1, 10, 32)
    w2, b2 = linear(k2, 32, 16)
    w3, b3 = linear(k3, 16, 1)
    return {"w1": w1, "b1": b1, "w2": w2, "b2": b2, "w3": w3, "b3": b3}


def reference_forward(x, p):
    """Pure-JAX reference matching nn.Linear semantics: y = x @ W.T + b."""
    hp = lax.Precision.HIGHEST
    h1 = jnp.maximum(jnp.dot(x, p["w1"].T, precision=hp) + p["b1"], 0.0)
    h2 = jnp.maximum(jnp.dot(h1, p["w2"].T, precision=hp) + p["b2"], 0.0)
    logits = jnp.dot(h2, p["w3"].T, precision=hp) + p["b3"]
    return jax.nn.sigmoid(logits)


if __name__ == "__main__":
    key = jax.random.PRNGKey(0)
    k_p, k_x1, k_x2 = jax.random.split(key, 3)
    params = init_params(k_p)

    # Small shape consistent with the module: batch=8, features=10.
    B = 8
    x = jax.random.normal(k_x1, (B, 10), jnp.float32)
    out = jax.block_until_ready(binary_classifier_forward(x, params))
    assert out.shape == (B, 1), out.shape
    ref = reference_forward(x, params)
    assert jnp.allclose(out, ref, atol=5e-3, rtol=1e-3), (out, ref)

    # Also exercise the tiled path: multiple grid steps + ragged last block.
    B2 = 300
    x2 = jax.random.normal(k_x2, (B2, 10), jnp.float32)
    out2 = jax.block_until_ready(binary_classifier_forward(x2, params))
    assert out2.shape == (B2, 1), out2.shape
    ref2 = reference_forward(x2, params)
    assert jnp.allclose(out2, ref2, atol=5e-3, rtol=1e-3), (out2, ref2)

    print("KERNEL_OK")
</pallas_src>

<mosaic_0001>
module attributes {stable_mosaic.version = 11 : i64} {
  func.func @mlp_kernel(%arg0: i32, %arg1: memref<8x10xf32, #tpu.memory_space<vmem>>, %arg2: memref<32x10xf32, #tpu.memory_space<vmem>>, %arg3: memref<32x1xf32, #tpu.memory_space<vmem>>, %arg4: memref<16x32xf32, #tpu.memory_space<vmem>>, %arg5: memref<16x1xf32, #tpu.memory_space<vmem>>, %arg6: memref<1x16xf32, #tpu.memory_space<vmem>>, %arg7: memref<1x1xf32, #tpu.memory_space<vmem>>, %arg8: memref<1x8xf32, #tpu.memory_space<vmem>>) attributes {dimension_semantics = [#tpu.dimension_semantics<parallel>], iteration_bounds = array<i64: 1>, scalar_prefetch = 0 : i64, scratch_operands = 0 : i64, tpu.core_type = #tpu.core_type<tc>, window_params = [{transform_indices = @transform_0, window_bounds = array<i64: 8, 10>}, {pipeline_mode = #tpu.pipeline_mode<synchronous>, transform_indices = @transform_1, window_bounds = array<i64: 32, 10>}, {pipeline_mode = #tpu.pipeline_mode<synchronous>, transform_indices = @transform_2, window_bounds = array<i64: 32, 1>}, {pipeline_mode = #tpu.pipeline_mode<synchronous>, transform_indices = @transform_3, window_bounds = array<i64: 16, 32>}, {pipeline_mode = #tpu.pipeline_mode<synchronous>, transform_indices = @transform_4, window_bounds = array<i64: 16, 1>}, {pipeline_mode = #tpu.pipeline_mode<synchronous>, transform_indices = @transform_5, window_bounds = array<i64: 1, 16>}, {pipeline_mode = #tpu.pipeline_mode<synchronous>, transform_indices = @transform_6, window_bounds = array<i64: 1, 1>}, {transform_indices = @transform_7, window_bounds = array<i64: 1, 8>}]} {
    %c0 = arith.constant 0 : index
    %c0_0 = arith.constant 0 : index
    %0 = vector.load %arg2[%c0, %c0_0] : memref<32x10xf32, #tpu.memory_space<vmem>>, vector<32x10xf32>
    %c0_1 = arith.constant 0 : index
    %c0_2 = arith.constant 0 : index
    %1 = vector.load %arg1[%c0_1, %c0_2] : memref<8x10xf32, #tpu.memory_space<vmem>>, vector<8x10xf32>
    %cst = arith.constant dense<0.000000e+00> : vector<32x8xf32>
    %2 = tpu.matmul %0, %1, %cst {dimension_numbers = #tpu.dot_dimension_numbers<[1], [1], [0], [0], [0, 0, 1, 0], [], []>} : vector<32x10xf32>, vector<8x10xf32>, vector<32x8xf32> -> vector<32x8xf32>
    %c0_3 = arith.constant 0 : index
    %c0_4 = arith.constant 0 : index
    %3 = vector.load %arg3[%c0_3, %c0_4] : memref<32x1xf32, #tpu.memory_space<vmem>>, vector<32x1xf32>
    %4 = vector.broadcast %3 : vector<32x1xf32> to vector<32x8xf32>
    %5 = arith.addf %2, %4 : vector<32x8xf32>
    %cst_5 = arith.constant 0.000000e+00 : f32
    %6 = vector.broadcast %cst_5 : f32 to vector<32x8xf32>
    %7 = arith.maximumf %5, %6 : vector<32x8xf32>
    %c0_6 = arith.constant 0 : index
    %c0_7 = arith.constant 0 : index
    %8 = vector.load %arg4[%c0_6, %c0_7] : memref<16x32xf32, #tpu.memory_space<vmem>>, vector<16x32xf32>
    %cst_8 = arith.constant dense<0.000000e+00> : vector<16x8xf32>
    %9 = tpu.matmul %8, %7, %cst_8 {dimension_numbers = #tpu.dot_dimension_numbers<[1], [0], [0], [1], [0, 0, 1, 1], [], []>} : vector<16x32xf32>, vector<32x8xf32>, vector<16x8xf32> -> vector<16x8xf32>
    %c0_9 = arith.constant 0 : index
    %c0_10 = arith.constant 0 : index
    %10 = vector.load %arg5[%c0_9, %c0_10] : memref<16x1xf32, #tpu.memory_space<vmem>>, vector<16x1xf32>
    %11 = vector.broadcast %10 : vector<16x1xf32> to vector<16x8xf32>
    %12 = arith.addf %9, %11 : vector<16x8xf32>
    %cst_11 = arith.constant 0.000000e+00 : f32
    %13 = vector.broadcast %cst_11 : f32 to vector<16x8xf32>
    %14 = arith.maximumf %12, %13 : vector<16x8xf32>
    %c0_12 = arith.constant 0 : index
    %c0_13 = arith.constant 0 : index
    %15 = vector.load %arg6[%c0_12, %c0_13] : memref<1x16xf32, #tpu.memory_space<vmem>>, vector<1x16xf32>
    %cst_14 = arith.constant dense<0.000000e+00> : vector<1x8xf32>
    %16 = tpu.matmul %15, %14, %cst_14 {dimension_numbers = #tpu.dot_dimension_numbers<[1], [0], [0], [1], [0, 0, 1, 1], [], []>} : vector<1x16xf32>, vector<16x8xf32>, vector<1x8xf32> -> vector<1x8xf32>
    %c0_15 = arith.constant 0 : index
    %c0_16 = arith.constant 0 : index
    %17 = vector.load %arg7[%c0_15, %c0_16] : memref<1x1xf32, #tpu.memory_space<vmem>>, vector<1x1xf32>
    %18 = vector.broadcast %17 : vector<1x1xf32> to vector<1x8xf32>
    %19 = arith.addf %16, %18 : vector<1x8xf32>
    %cst_17 = arith.constant 5.000000e-01 : f32
    %20 = vector.broadcast %cst_17 : f32 to vector<1x8xf32>
    %21 = arith.mulf %20, %19 : vector<1x8xf32>
    %22 = math.tanh %21 : vector<1x8xf32>
    %cst_18 = arith.constant 5.000000e-01 : f32
    %23 = vector.broadcast %cst_18 : f32 to vector<1x8xf32>
    %24 = arith.mulf %23, %22 : vector<1x8xf32>
    %cst_19 = arith.constant 5.000000e-01 : f32
    %25 = vector.broadcast %cst_19 : f32 to vector<1x8xf32>
    %26 = arith.addf %24, %25 : vector<1x8xf32>
    %c0_20 = arith.constant 0 : index
    %c0_21 = arith.constant 0 : index
    %27 = vector.load %arg8[%c0_20, %c0_21] : memref<1x8xf32, #tpu.memory_space<vmem>>, vector<1x8xf32>
    tpu.vector_store %arg8[%c0_20, %c0_21], %26 {strides = array<i32>} : memref<1x8xf32, #tpu.memory_space<vmem>>, vector<1x8xf32>,
    return
  }
  func.func @transform_0(%arg0: i32) -> (i32, i32) {
    %c0_i32 = arith.constant 0 : i32
    %c0_i32_0 = arith.constant 0 : i32
    return %arg0, %c0_i32 : i32, i32
  }
  func.func @transform_1(%arg0: i32) -> (i32, i32) {
    %c0_i32 = arith.constant 0 : i32
    %c0_i32_0 = arith.constant 0 : i32
    %c0_i32_1 = arith.constant 0 : i32
    return %c0_i32, %c0_i32_0 : i32, i32
  }
  func.func @transform_2(%arg0: i32) -> (i32, i32) {
    %c0_i32 = arith.constant 0 : i32
    %c0_i32_0 = arith.constant 0 : i32
    %c0_i32_1 = arith.constant 0 : i32
    return %c0_i32, %c0_i32_0 : i32, i32
  }
  func.func @transform_3(%arg0: i32) -> (i32, i32) {
    %c0_i32 = arith.constant 0 : i32
    %c0_i32_0 = arith.constant 0 : i32
    %c0_i32_1 = arith.constant 0 : i32
    return %c0_i32, %c0_i32_0 : i32, i32
  }
  func.func @transform_4(%arg0: i32) -> (i32, i32) {
    %c0_i32 = arith.constant 0 : i32
    %c0_i32_0 = arith.constant 0 : i32
    %c0_i32_1 = arith.constant 0 : i32
    return %c0_i32, %c0_i32_0 : i32, i32
  }
  func.func @transform_5(%arg0: i32) -> (i32, i32) {
    %c0_i32 = arith.constant 0 : i32
    %c0_i32_0 = arith.constant 0 : i32
    %c0_i32_1 = arith.constant 0 : i32
    return %c0_i32, %c0_i32_0 : i32, i32
  }
  func.func @transform_6(%arg0: i32) -> (i32, i32) {
    %c0_i32 = arith.constant 0 : i32
    %c0_i32_0 = arith.constant 0 : i32
    %c0_i32_1 = arith.constant 0 : i32
    return %c0_i32, %c0_i32_0 : i32, i32
  }
  func.func @transform_7(%arg0: i32) -> (i32, i32) {
    %c0_i32 = arith.constant 0 : i32
    %c0_i32_0 = arith.constant 0 : i32
    return %c0_i32, %arg0 : i32, i32
  }
}

</mosaic_0001>

<bundles_post_ra>
// kernel: binary_classifier_forward.1
= control target key start
LH: loop header
LB: loop body
LE: loop exit
PB: predicated region body
PF: predicated region fallthrough
CT: control target
= control target key end

     0   :  { %s345_s0 = inlined_call_operand.vmem [shape: f32[8,10], index: 0, kind: input, shape index: {}]   ;;  %s346_s1 = inlined_call_operand.vmem [shape: f32[32,10], index: 1, kind: input, shape index: {}]   ;;  %s347_s2 = inlined_call_operand.vmem [shape: f32[32,1], index: 2, kind: input, shape index: {}]   ;;  %s348_s3 = inlined_call_operand.vmem [shape: f32[16,32], index: 3, kind: input, shape index: {}]   ;;  %s349_s4 = inlined_call_operand.vmem [shape: f32[16,1], index: 4, kind: input, shape index: {}]   ;;  %s350_s5 = inlined_call_operand.vmem [shape: f32[1,16], index: 5, kind: input, shape index: {}]   ;;  %s351_s6 = inlined_call_operand.<no memory space> [shape: f32[1,1], index: 6, kind: input, shape index: {}]   ;;  %s352_s7 = inlined_call_operand.hbm [shape: f32[1,8], index: 7, kind: output, shape index: {}]  }
   0x1   :  { %v12_v0 = vstv %s351_s6 }
   0x2   :  { %13 = vst [vmem:[#allocation2] sm:$0x1] %v12_v0 }
   0x3   :  { %v33_v1 = vld [vmem:[%s345_s0] sm:$0xff]  ;;  %vm58_vm0 = vcmask 80896   ;;  %v37_v2 = vld [vmem:[%s347_s2 + $0x18] sm:$0xff]  ;;  %v31_v3 = vld [vmem:[%s346_s1 + $0x10] sm:$0xff]  ;;  %v249_v5 = vmov 0  }
   0x4   :  { %215 = vmatpush.xpose.msk.msra.mxu3 %vm58_vm0, %v33_v1  ;;  %207 = vmatpush.xpose.msk.msra.mxu0 %vm58_vm0, %v33_v1  ;;  %v29_v4 = vld [vmem:[%s346_s1] sm:$0xff]  ;;  %v35_v6 = vld [vmem:[%s347_s2 + $0x8] sm:$0xff] }
   0x5   :  { %218 = vset.pattern.permute.xlu0 %v249_v5  ;;  %219 = vset.pattern.permute.xlu1 %v249_v5 }
   0x6   :  { %55 = vperm.xlu0 %218, %v37_v2   ;;  %45 = vperm.xlu1 %219, %v35_v6  }
   0x7   :  { %14 = vsyncpa [#allocation4], 0  ;;  %210 = vmatmul.msk.f32.vlgmr.msra.gmra.mxu3 %vm58_vm0, %v31_v3  ;;  %208 = vmatmul.msk.f32.vlgmr.msra.gmra.mxu0 %vm58_vm0, %v29_v4  ;;  %v36_v7 = vld [vmem:[%s347_s2 + $0x10] sm:$0xff]  ;;  %v34_v8 = vld [vmem:[%s347_s2] sm:$0xff]  ;;  %vm121_vm1 = vcmask 261120   ;;  %vm161_vm2 = vcmask 130048  }
   0x8   :  { %220 = vset.pattern.permute.xlu2 %v249_v5  ;;  %v32_v9 = vld [vmem:[%s346_s1 + $0x18] sm:$0xff]  ;;  %v30_v10 = vld [vmem:[%s346_s1 + $0x8] sm:$0xff]  ;;  %v109_v17 = vld [vmem:[%s349_s4] sm:$0xff]  ;;  %s198_s29 = sshll.u32 %s352_s7, 4  ;;  %vm189_vm3 = vcmask 57344   ;;  %s199_s29 = int_to_ptr.hbm [resolvable:$true] %s198_s29 }
   0x9   :  { %v154_v11 = vld [vmem:[#allocation2] sm:$0x1]  ;;  %v110_v12 = vld [vmem:[%s349_s4 + $0x8] sm:$0xff] }
   0xa   :  { %118 = vperm.xlu2 %220, %v110_v12   ;;  %v107_v30 = vld [vmem:[%s348_s3] sm:$0xff]  ;;  %v108_v31 = vld [vmem:[%s348_s3 + $0x8] sm:$0xff]  ;;  %s250_s3 = smov [#allocation3]  }
   0xb   :  { %v153_v40 = vld [vmem:[%s350_s5] sm:$0x1]  ;;  %s196_s26 = sshll.u32 %s250_s3, 4  ;;  %s197_s26 = int_to_ptr.vmem [resolvable:$true] %s196_s26 }
   0xe   :  { %50 = vperm.xlu0 %218, %v36_v7   ;;  %40 = vperm.xlu1 %219, %v34_v8  }
   0xf   :  { %211 = vmatmul.msk.f32.gmra.mxu3 %vm58_vm0, %v32_v9  ;;  %209 = vmatmul.msk.f32.gmra.mxu0 %vm58_vm0, %v30_v10 }
  0x12   :  { %113 = vperm.xlu2 %220, %v109_v17  }
  0x16   :  { %157 = vperm.xlu0 %218, %v154_v11  }
  0x64   :  { %v119_v32 = vpop.permute.xlu2 %118 }
  0x6c   :  { %v114_v34 = vpop.permute.xlu2 %113 }
  0x78   :  { %v56_v13 = vpop.permute.xlu0 %55  ;;  %v46_v15 = vpop.permute.xlu1 %45 }
  0x80   :  { %v51_v18 = vpop.permute.xlu0 %50  ;;  %v41_v23 = vpop.permute.xlu1 %40 }
  0x84   :  { %v91_v14 = vpop.f32.mrf.mxu0 }
  0x85   :  { %v92_v27 = vadd.f32 %v91_v14, %v41_v23 }
  0x87   :  { %v103_v29 = vmax.f32 %v92_v27, 0.0 }
  0x88   :  { %v158_v41 = vpop.permute.xlu0 %157 }
  0x89   :  { %v160_v42 = vperm.slane %v158_v41, 0 }
  0x8a   :  { %v97_v16 = vpop.f32.mrf.mxu3 }
  0x8b   :  { %v98_v21 = vadd.f32 %v97_v16, %v51_v18 }
  0x8c   :  { %v94_v19 = vpop.f32.mrf.mxu0 }
  0x8d   :  { %v95_v24 = vadd.f32 %v94_v19, %v46_v15  ;;  %v105_v26 = vmax.f32 %v98_v21, 0.0 }
  0x8f   :  { %v104_v28 = vmax.f32 %v95_v24, 0.0 }
  0x92   :  { %v100_v20 = vpop.f32.mrf.mxu3 }
  0x93   :  { %v101_v22 = vadd.f32 %v100_v20, %v56_v13 }
  0x95   :  { %v106_v25 = vmax.f32 %v101_v22, 0.0 }
  0x97   :  { %140 = vmatpush.msra.mxu1 %v106_v25 }
  0x99   :  { %141 = vmatpush.msra.mxu1 %v105_v26 }
  0x9b   :  { %142 = vmatpush.msra.mxu1 %v104_v28 }
  0x9d   :  { %143 = vmatpush.msra.mxu1 %v103_v29 }
  0x9e   :  { %212 = vmatmul.msk.f32.vlgmr.msra.gmra.mxu1 %vm121_vm1, %v107_v30 }
  0xa6   :  { %213 = vmatmul.msk.f32.gmra.mxu1 %vm121_vm1, %v108_v31 }
 0x11b   :  { %v145_v33 = vpop.f32.mrf.mxu1 }
 0x11c   :  { %v146_v36 = vadd.f32 %v145_v33, %v114_v34 }
 0x11e   :  { %v151_v39 = vmax.f32 %v146_v36, 0.0 }
 0x123   :  { %v148_v35 = vpop.f32.mrf.mxu1 }
 0x124   :  { %v149_v37 = vadd.f32 %v148_v35, %v119_v32 }
 0x126   :  { %v152_v38 = vmax.f32 %v149_v37, 0.0 }
 0x128   :  { %179 = vmatpush.msra.mxu2 %v152_v38 }
 0x12a   :  { %180 = vmatpush.msra.mxu2 %v151_v39 }
 0x12b   :  { %214 = vmatmul.msk.f32.vlgmr.msra.gmra.mxu2 %vm161_vm2, %v153_v40 }
 0x1ae   :  { %v182_v43 = vpop.f32.mrf.mxu2 }
 0x1af   :  { %v183_v44 = vadd.f32 %v182_v43, %v160_v42 }
 0x1b1   :  { %v185_v45 = vmul.f32 0.5, %v183_v44 }
 0x1b3   :  { %221 = vtanh.f32 %v185_v45 }
 0x1b9   :  { %v222_v46 = vpop.eup %221 }
 0x1ba   :  { %v187_v47 = vmul.f32 0.5, %v222_v46 }
 0x1bc   :  { %v188_v48 = vadd.f32 0.5, %v187_v47 }
 0x1be   :  { %190 = vst.msk [vmem:[#allocation3] sm:$0x1] %vm189_vm3, %v188_v48 }
 0x1bf   :  { %201 = dma.vmem_to_hbm [thread:$0]  %s197_s26, 16, %s199_s29, [#allocation4]  }
 0x1c0   :  { %247 = dma.done.wait [#allocation4], 16  }
 0x1c1   :  { %248 = vsyncadd [#allocation4], 4294967280 }
 0x1c2   :  { %206 = vsyncpa [#allocation4], 1 }

</bundles_post_ra>
